<compile_context>
chip_gen: v7x
topology: tpu7x:2x2x1
jax: 0.10.0
libtpu: 0.0.40
codegen_flags: <defaults>
</compile_context>

<pallas_src>
import functools

import jax
import jax.numpy as jnp
from jax.experimental import pallas as pl
from jax.experimental.pallas import tpu as pltpu


# ------------------------------ kernels ------------------------------------ #

def _router_loss_single_kernel(x_ref, o_ref, *, batch, n_exp):
    """Single-tile RouterLoss: full (batch, num_experts) resident in VMEM."""
    x = x_ref[...].astype(jnp.float32)                                   # (B, E)
    # Mean over batch (sublane-axis reduce on the XLU), kept 2D for layout.
    mean_logits = jnp.sum(x, axis=0, keepdims=True) * (1.0 / batch)      # (1, E)
    # MSE against zeros == mean of squares over experts (lane-axis reduce).
    loss = jnp.sum(mean_logits * mean_logits, axis=1,
                   keepdims=True) * (1.0 / n_exp)                        # (1, 1)
    o_ref[...] = loss.astype(o_ref.dtype)


def _router_loss_tiled_kernel(x_ref, o_ref, acc_ref, *, batch, n_exp):
    """Batch-tiled RouterLoss: accumulate per-expert column sums over the grid."""
    i = pl.program_id(0)

    @pl.when(i == 0)
    def _():
        acc_ref[...] = jnp.zeros_like(acc_ref)

    x = x_ref[...].astype(jnp.float32)                                   # (TB, E)
    acc_ref[...] += jnp.sum(x, axis=0, keepdims=True)                    # (1, E)

    @pl.when(i == pl.num_programs(0) - 1)
    def _():
        mean_logits = acc_ref[...] * (1.0 / batch)
        loss = jnp.sum(mean_logits * mean_logits, axis=1,
                       keepdims=True) * (1.0 / n_exp)
        o_ref[...] = loss.astype(o_ref.dtype)


# ------------------------------ wrapper ------------------------------------ #

def router_loss(routing_logits: jnp.ndarray, *, block_batch: int = 512) -> jnp.ndarray:
    """RouterLoss forward.  Returns a scalar (float32)."""
    assert routing_logits.ndim == 2, "expected (batch_size, num_experts)"
    batch, n_exp = routing_logits.shape

    if batch <= block_batch:
        # Small shapes: one fused, grid-less kernel; only a (1,1) scalar stored.
        kernel = functools.partial(_router_loss_single_kernel,
                                   batch=batch, n_exp=n_exp)
        out = pl.pallas_call(
            kernel,
            out_shape=jax.ShapeDtypeStruct((1, 1), jnp.float32),
            in_specs=[pl.BlockSpec(memory_space=pltpu.MemorySpace.VMEM)],
            out_specs=pl.BlockSpec(memory_space=pltpu.MemorySpace.VMEM),
        )(routing_logits)
        return out[0, 0]

    # Realistic batch sizes: grid over the batch dimension only.  Pad the batch
    # with zero rows (zeros don't change the column sums; we still divide by
    # the true batch size).
    num_tiles = pl.cdiv(batch, block_batch)
    padded = num_tiles * block_batch
    x = routing_logits
    if padded != batch:
        x = jnp.pad(x, ((0, padded - batch), (0, 0)))

    kernel = functools.partial(_router_loss_tiled_kernel,
                               batch=batch, n_exp=n_exp)
    out = pl.pallas_call(
        kernel,
        out_shape=jax.ShapeDtypeStruct((1, 1), jnp.float32),
        grid=(num_tiles,),
        in_specs=[pl.BlockSpec((block_batch, n_exp), lambda i: (i, 0))],
        out_specs=pl.BlockSpec((1, 1), lambda i: (0, 0)),
        scratch_shapes=[pltpu.VMEM((1, n_exp), jnp.float32)],
        compiler_params=pltpu.CompilerParams(
            dimension_semantics=("arbitrary",)),  # sequential accumulation
    )(x)
    return out[0, 0]


# pure-JAX reference
def router_loss_ref(routing_logits: jnp.ndarray) -> jnp.ndarray:
    mean_logits = jnp.mean(routing_logits.astype(jnp.float32), axis=0)
    return jnp.mean(mean_logits * mean_logits)


# ------------------------------- main --------------------------------------- #

if __name__ == "__main__":
    key = jax.random.PRNGKey(0)
    k1, k2 = jax.random.split(key)

    # Small case: single fused, grid-less kernel.
    batch, num_experts = 8, 16
    x = jax.random.normal(k1, (batch, num_experts), jnp.float32)

    out = router_loss(x)
    out = jax.block_until_ready(out)
    ref = router_loss_ref(x)
    assert out.shape == ()
    assert jnp.allclose(out, ref, atol=1e-6, rtol=1e-5), "small-case mismatch"

    # Larger (non-multiple) batch: exercises the batch-tiled accumulator path.
    x_big = jax.random.normal(k2, (300, 16), jnp.float32)
    out_big = jax.block_until_ready(router_loss(x_big, block_batch=128))
    ref_big = router_loss_ref(x_big)
    assert jnp.allclose(out_big, ref_big, atol=1e-6, rtol=1e-5), "tiled mismatch"

    print("KERNEL_OK")
</pallas_src>

<mosaic_0001>
module attributes {stable_mosaic.version = 11 : i64} {
  func.func @_router_loss_single_kernel(%arg0: memref<8x16xf32, #tpu.memory_space<vmem>>, %arg1: memref<1x1xf32, #tpu.memory_space<vmem>>) attributes {dimension_semantics = [], scalar_prefetch = 0 : i64, scratch_operands = 0 : i64, tpu.core_type = #tpu.core_type<tc>} {
    %c0 = arith.constant 0 : index
    %c0_0 = arith.constant 0 : index
    %0 = vector.load %arg0[%c0, %c0_0] : memref<8x16xf32, #tpu.memory_space<vmem>>, vector<8x16xf32>
    %cst = arith.constant dense<0.000000e+00> : vector<16xf32>
    %1 = vector.multi_reduction <add>, %0, %cst [0] : vector<8x16xf32> to vector<16xf32>
    %2 = vector.shape_cast %1 : vector<16xf32> to vector<1x16xf32>
    %cst_1 = arith.constant 1.250000e-01 : f32
    %3 = vector.broadcast %cst_1 : f32 to vector<1x16xf32>
    %4 = arith.mulf %2, %3 : vector<1x16xf32>
    %5 = arith.mulf %4, %4 : vector<1x16xf32>
    %cst_2 = arith.constant dense<0.000000e+00> : vector<1xf32>
    %6 = vector.multi_reduction <add>, %5, %cst_2 [1] : vector<1x16xf32> to vector<1xf32>
    %7 = vector.shape_cast %6 : vector<1xf32> to vector<1x1xf32>
    %cst_3 = arith.constant 6.250000e-02 : f32
    %8 = vector.broadcast %cst_3 : f32 to vector<1x1xf32>
    %9 = arith.mulf %7, %8 : vector<1x1xf32>
    %c0_4 = arith.constant 0 : index
    %c0_5 = arith.constant 0 : index
    %10 = vector.load %arg1[%c0_4, %c0_5] : memref<1x1xf32, #tpu.memory_space<vmem>>, vector<1x1xf32>
    tpu.vector_store %arg1[%c0_4, %c0_5], %9 {strides = array<i32>} : memref<1x1xf32, #tpu.memory_space<vmem>>, vector<1x1xf32>,
    return
  }
}

</mosaic_0001>

<bundles_post_ra>
// kernel: tpu_custom_call.1
= control target key start
LH: loop header
LB: loop body
LE: loop exit
PB: predicated region body
PF: predicated region fallthrough
CT: control target
= control target key end

     0   :  { %6 = vsyncpa [#allocation3], 0  ;;  %s139_s0 = inlined_call_operand.hbm [shape: f32[8,16], index: 0, kind: input, shape index: {}]   ;;  %s140_s1 = inlined_call_operand.hbm [shape: f32[1,1], index: 1, kind: output, shape index: {}]  }
   0x1   :  { %7 = vsyncpa [#allocation4], 0  ;;  %s103_s6 = smov [#allocation2]   ;;  %s55_s10 = scalar_lea.hbm %s139_s0, 128 }
   0x2   :  { %s14_s7 = sshll.u32 %s103_s6, 4  ;;  %p56_p0 = scmp.ne.s32.totalorder %s139_s0, %s55_s10  ;;  %s15_s7 = int_to_ptr.vmem [resolvable:$true] %s14_s7 }
   0x3   :  { %p59_p1 = scmp.lt.u32.totalorder %s55_s10, %s139_s0 }
   0x5   :  { %p61_p2 = pnand %p59_p1, %p56_p0 }
   0x7   :  { %64 = shalt.err (!%p61_p2)
}
   0x8   :  { %s65_s15 = scalar_lea.vmem %s15_s7, 128  ;;  %p70_p4 = scmp.lt.s32.totalorder %s15_s7, %s15_s7 }
   0x9   :  { %p66_p3 = scmp.ne.s32.totalorder %s15_s7, %s65_s15  ;;  %p71_p5 = scmp.lt.s32.totalorder %s65_s15, %s65_s15 }
   0xb   :  { %p72_p6 = por %p71_p5, %p70_p4 }
   0xd   :  { %p73_p7 = pnand %p72_p6, %p66_p3 }
   0xf   :  { %76 = shalt.err (!%p73_p7)
}
  0x10   :  { %17 = dma.hbm_to_vmem [thread:$0]  %s139_s0, 128, %s15_s7, [#allocation3]  }
  0x11   :  { %99 = dma.done.wait [#allocation3], 128  }
  0x12   :  { %100 = vsyncadd [#allocation3], 4294967168  ;;  %vm22_vm0 = vcmask 130048   ;;  %v21_v0 = vld [vmem:[#allocation2] sm:$0xff]  ;;  %s104_s18 = smov [#allocation5]   ;;  %vm36_vm1 = vcmask 0  }
  0x13   :  { %v23_v1 = vsel %vm22_vm0, %v21_v0, 0.0  ;;  %s44_s19 = sshll.u32 %s104_s18, 4  ;;  %s45_s19 = int_to_ptr.vmem [resolvable:$true] %s44_s19 }
  0x14   :  { %v24_v2 = vrot.slane %v23_v1, 4  ;;  %s77_s0 = scalar_lea.vmem %s45_s19, 16  ;;  %s81_s20 = scalar_lea.vmem %s45_s19, 32 }
  0x15   :  { %p78_p8 = scmp.ne.s32.totalorder %s45_s19, %s77_s0  ;;  %p82_p9 = scmp.lt.s32.totalorder %s45_s19, %s45_s19 }
  0x16   :  { %v25_v3 = vadd.f32 %v24_v2, %v23_v1  ;;  %p83_p10 = scmp.lt.s32.totalorder %s81_s20, %s77_s0 }
  0x18   :  { %v26_v4 = vrot.slane %v25_v3, 2  ;;  %p84_p11 = por %p83_p10, %p82_p9 }
  0x1a   :  { %v27_v5 = vadd.f32 %v26_v4, %v25_v3  ;;  %p85_p12 = pnand %p84_p11, %p78_p8 }
  0x1c   :  { %v28_v6 = vrot.slane %v27_v5, 1 }
  0x1e   :  { %v29_v7 = vadd.f32 %v28_v6, %v27_v5 }
  0x20   :  { %v30_v8 = vmul.f32 0.125, %v29_v7 }
  0x22   :  { %v31_v9 = vmul.f32 %v30_v8, %v30_v8 }
  0x24   :  { %v32_v10 = vsel %vm22_vm0, %v31_v9, 0.0 }
  0x25   :  { %33 = vadd.xlane.f32.xlu0 %v32_v10 }
  0xb2   :  { %v34_v11 = vpop.xlane.xlu0 %33 }
  0xb3   :  { %v35_v12 = vmul.f32 0.0625, %v34_v11 }
  0xb5   :  { %37 = vst.msk [vmem:[#allocation5] sm:$0x1] %vm36_vm1, %v35_v12 }
  0xb6   :  { %88 = shalt.err (!%p85_p12)
}
  0xb7   :  { %s89_s23 = scalar_lea.hbm %s140_s1, 16 }
  0xb8   :  { %p90_p13 = scmp.ne.s32.totalorder %s140_s1, %s89_s23  ;;  %p93_p0 = scmp.lt.u32.totalorder %s89_s23, %s140_s1 }
  0xba   :  { %p95_p1 = pnand %p93_p0, %p90_p13 }
  0xbc   :  { %98 = shalt.err (!%p95_p1)
}
  0xbd   :  { %47 = dma.vmem_to_hbm [thread:$0]  %s45_s19, 16, %s140_s1, [#allocation4]  }
  0xbe   :  { %101 = dma.done.wait [#allocation4], 16  }
  0xbf   :  { %102 = vsyncadd [#allocation4], 4294967280 }
  0xc0   :  { %51 = vsyncpa [#allocation3], 1 }
  0xc1   :  { %52 = vsyncpa [#allocation4], 1 }

</bundles_post_ra>
